<compile_context>
chip_gen: v7x
topology: tpu7x:2x2x1
jax: 0.10.0
libtpu: 0.0.40
codegen_flags: <defaults>
</compile_context>

<pallas_src>
import functools

import jax
import jax.numpy as jnp
from jax.experimental import pallas as pl
from jax.experimental.pallas import tpu as pltpu


def _attention_kernel(q_ref, k_ref, v_ref, wq_ref, wk_ref, wv_ref, mask_ref,
                      o_ref, qh_ref, m_ref, l_ref, acc_ref,
                      *, scaling, group, head_dim):
    """One (head_group, q_tile, kv_tile) step of projection + flash attention."""
    kv = pl.program_id(2)
    tq = q_ref.shape[0]
    tk = k_ref.shape[0]

    @pl.when(kv == 0)
    def _():
        # Project the query tile for this head group once per (group, q_tile):
        # (TQ, E) x (G*D, E), contracting E on both sides (no transpose).
        qh = jax.lax.dot_general(
            q_ref[...], wq_ref[...], (((1,), (1,)), ((), ())),
            preferred_element_type=jnp.float32)
        qh = qh * scaling                                # fold 1/sqrt(D) into Q
        qh = qh.reshape(tq, group, head_dim).transpose(1, 0, 2)   # (G, TQ, D)
        qh_ref[...] = qh.astype(jnp.bfloat16)
        m_ref[...] = jnp.full_like(m_ref, -jnp.inf)
        l_ref[...] = jnp.zeros_like(l_ref)
        acc_ref[...] = jnp.zeros_like(acc_ref)

    # Project this KV tile for the head group: (TK, E) x (G*D, E) -> (TK, G*D).
    kh = jax.lax.dot_general(
        k_ref[...], wk_ref[...], (((1,), (1,)), ((), ())),
        preferred_element_type=jnp.float32)
    vh = jax.lax.dot_general(
        v_ref[...], wv_ref[...], (((1,), (1,)), ((), ())),
        preferred_element_type=jnp.float32)
    kh = kh.reshape(tk, group, head_dim).transpose(1, 0, 2).astype(jnp.bfloat16)
    vh = vh.reshape(tk, group, head_dim).transpose(1, 0, 2).astype(jnp.bfloat16)

    # Per-head scores for this tile (scale already folded into qh): (G, TQ, TK).
    s = jnp.einsum('gqd,gkd->gqk', qh_ref[...], kh,
                   preferred_element_type=jnp.float32)
    s = s + mask_ref[...].astype(jnp.float32)[None, :, :]   # additive 0 / -1e30

    # Online softmax update across kv tiles (normalization deferred).
    m_prev = m_ref[...]
    m_new = jnp.maximum(m_prev, jnp.max(s, axis=-1, keepdims=True))
    alpha = jnp.exp(m_prev - m_new)
    p = jnp.exp(s - m_new)
    l_ref[...] = alpha * l_ref[...] + jnp.sum(p, axis=-1, keepdims=True)
    acc_ref[...] = alpha * acc_ref[...] + jnp.einsum(
        'gqk,gkd->gqd', p.astype(jnp.bfloat16), vh,
        preferred_element_type=jnp.float32)
    m_ref[...] = m_new

    @pl.when(kv == pl.num_programs(2) - 1)
    def _():
        # Single deferred normalization via EUP reciprocal.
        o = acc_ref[...] * pl.reciprocal(l_ref[...], approx=True)   # (G, TQ, D)
        o_ref[...] = o.transpose(1, 0, 2).reshape(
            tq, group * head_dim).astype(o_ref.dtype)


def _out_proj_kernel(x_ref, w_ref, o_ref, acc_ref):
    """out = x @ W.T (F.linear), tiled, with an f32 accumulator over K."""
    @pl.when(pl.program_id(2) == 0)
    def _():
        acc_ref[...] = jnp.zeros_like(acc_ref)

    acc_ref[...] += jax.lax.dot_general(
        x_ref[...], w_ref[...], (((1,), (1,)), ((), ())),
        preferred_element_type=jnp.float32)

    @pl.when(pl.program_id(2) == pl.num_programs(2) - 1)
    def _():
        o_ref[...] = acc_ref[...].astype(o_ref.dtype)


def _pick_tile(dim, target):
    """Largest tile <= target that divides dim (falls back to dim itself)."""
    t = min(dim, target)
    while dim % t:
        t -= 1
    return t


def multi_head_attention(q, k, v, mask, wq, wk, wv, wo, *, nhead):
    """Pallas forward pass of MultiHeadAttention (eval mode, dropout=identity)."""
    seq, emb = q.shape
    head_dim = emb // nhead
    scaling = float(head_dim) ** (-0.5)

    # Heads per grid step: aim for projection width group*head_dim >= 256
    # (MXU is 256 wide on v6e/v7x) while dividing nhead.
    group = max(1, min(nhead, -(-256 // head_dim)))
    while nhead % group:
        group -= 1
    gd = group * head_dim
    n_groups = nhead // group

    tq = _pick_tile(seq, 512)     # query tile
    tk = _pick_tile(seq, 512)     # kv tile (online-softmax axis)

    bf = jnp.bfloat16
    q_bf, k_bf, v_bf = q.astype(bf), k.astype(bf), v.astype(bf)
    wq_bf, wk_bf, wv_bf, wo_bf = (w.astype(bf) for w in (wq, wk, wv, wo))
    # Additive mask: 0 where visible, -1e30 where masked.
    mask_add = jnp.where(mask, jnp.float32(-1e30), jnp.float32(0.0)).astype(bf)

    kernel = functools.partial(_attention_kernel, scaling=scaling,
                               group=group, head_dim=head_dim)

    # Explicit scoped-VMEM budget: double-buffered bf16 blocks + f32 scratch,
    # with generous headroom (instead of relying on the default limit).
    blk_bytes = 2 * 2 * (tq * emb + 2 * tk * emb + 3 * gd * emb
                         + tq * tk + tq * gd)
    scratch_bytes = 2 * group * tq * head_dim + 4 * group * tq * (head_dim + 2)
    vmem_bytes = int(min(48 * 1024 * 1024,
                         max(8 * 1024 * 1024, 4 * (blk_bytes + scratch_bytes))))

    attn = pl.pallas_call(
        kernel,
        out_shape=jax.ShapeDtypeStruct((seq, emb), bf),
        grid_spec=pltpu.PrefetchScalarGridSpec(
            num_scalar_prefetch=0,
            grid=(n_groups, seq // tq, seq // tk),
            in_specs=[
                pl.BlockSpec((tq, emb), lambda g, i, t: (i, 0)),   # q tile
                pl.BlockSpec((tk, emb), lambda g, i, t: (t, 0)),   # k tile
                pl.BlockSpec((tk, emb), lambda g, i, t: (t, 0)),   # v tile
                pl.BlockSpec((gd, emb), lambda g, i, t: (g, 0)),   # Wq row block
                pl.BlockSpec((gd, emb), lambda g, i, t: (g, 0)),   # Wk row block
                pl.BlockSpec((gd, emb), lambda g, i, t: (g, 0)),   # Wv row block
                pl.BlockSpec((tq, tk), lambda g, i, t: (i, t)),    # additive mask
            ],
            out_specs=pl.BlockSpec((tq, gd), lambda g, i, t: (i, g)),
            scratch_shapes=[
                pltpu.VMEM((group, tq, head_dim), bf),             # projected Q
                pltpu.VMEM((group, tq, 1), jnp.float32),           # running max
                pltpu.VMEM((group, tq, 1), jnp.float32),           # running sum
                pltpu.VMEM((group, tq, head_dim), jnp.float32),    # unnormalized acc
            ]),
        compiler_params=pltpu.CompilerParams(
            dimension_semantics=("parallel", "parallel", "arbitrary"),
            vmem_limit_bytes=vmem_bytes),
    )(q_bf, k_bf, v_bf, wq_bf, wk_bf, wv_bf, mask_add)

    # Output projection: single wide matmul over the concatenated heads.
    tm = _pick_tile(seq, 256)
    tn = _pick_tile(emb, 256)
    tkk = _pick_tile(emb, 512)
    out = pl.pallas_call(
        _out_proj_kernel,
        out_shape=jax.ShapeDtypeStruct((seq, emb), jnp.float32),
        grid_spec=pltpu.PrefetchScalarGridSpec(
            num_scalar_prefetch=0,
            grid=(seq // tm, emb // tn, emb // tkk),
            in_specs=[
                pl.BlockSpec((tm, tkk), lambda i, j, kk: (i, kk)),   # concat heads
                pl.BlockSpec((tn, tkk), lambda i, j, kk: (j, kk)),   # Wo block
            ],
            out_specs=pl.BlockSpec((tm, tn), lambda i, j, kk: (i, j)),
            scratch_shapes=[pltpu.VMEM((tm, tn), jnp.float32)]),
        compiler_params=pltpu.CompilerParams(
            dimension_semantics=("parallel", "parallel", "arbitrary")),
    )(attn, wo_bf)
    return out


def _xavier_uniform(key, shape):
    fan_in, fan_out = shape[1], shape[0]
    bound = (6.0 / (fan_in + fan_out)) ** 0.5
    return jax.random.uniform(key, shape, jnp.float32, -bound, bound)


def _reference(q, k, v, mask, wq, wk, wv, wo, nhead, matmul_dtype=jnp.float32):
    """Pure-JAX reference mirroring the PyTorch forward (eval mode).

    matmul_dtype selects the matmul-input precision (f32 exact reference, or
    bf16 to mirror the kernel's bf16-input / f32-accumulate policy)."""
    seq, emb = q.shape
    hd = emb // nhead
    scaling = float(hd) ** (-0.5)
    dt = matmul_dtype

    def lin(x, w):   # F.linear(x, w) == x @ w.T
        return jax.lax.dot_general(x.astype(dt), w.astype(dt),
                                   (((1,), (1,)), ((), ())),
                                   preferred_element_type=jnp.float32)

    Q = lin(q, wq).reshape(seq, nhead, hd).transpose(1, 0, 2)
    K = lin(k, wk).reshape(seq, nhead, hd).transpose(1, 0, 2)
    V = lin(v, wv).reshape(seq, nhead, hd).transpose(1, 0, 2)
    w = jnp.einsum('hsd,htd->hst', Q.astype(dt), K.astype(dt),
                   preferred_element_type=jnp.float32) * scaling
    w = jnp.where(mask[None, :, :], -1e30, w)
    s = jax.nn.softmax(w, axis=-1)
    o = jnp.einsum('hst,htd->hsd', s.astype(dt), V.astype(dt),
                   preferred_element_type=jnp.float32)
    o = o.transpose(1, 0, 2).reshape(seq, emb)
    return lin(o, wo)


if __name__ == "__main__":
    seq, emb, nhead = 8, 32, 4

    key = jax.random.PRNGKey(0)
    kq, kk_, kv_, kwq, kwk, kwv, kwo = jax.random.split(key, 7)

    q = jax.random.normal(kq, (seq, emb), jnp.float32)
    k = jax.random.normal(kk_, (seq, emb), jnp.float32)
    v = jax.random.normal(kv_, (seq, emb), jnp.float32)

    wq = _xavier_uniform(kwq, (emb, emb))
    wk = _xavier_uniform(kwk, (emb, emb))
    wv = _xavier_uniform(kwv, (emb, emb))
    wo = _xavier_uniform(kwo, (emb, emb))

    # Causal-style boolean mask: True == masked (filled with -1e30).
    row = jnp.arange(seq)[:, None]
    col = jnp.arange(seq)[None, :]
    mask = col > row   # (seq, seq) bool

    out = multi_head_attention(q, k, v, mask, wq, wk, wv, wo, nhead=nhead)
    out = jax.block_until_ready(out)

    ref_mixed = _reference(q, k, v, mask, wq, wk, wv, wo, nhead,
                           matmul_dtype=jnp.bfloat16)
    ref_f32 = _reference(q, k, v, mask, wq, wk, wv, wo, nhead,
                         matmul_dtype=jnp.float32)

    assert out.shape == (seq, emb)
    # The kernel uses bf16 matmul inputs with f32 accumulation: compare tightly
    # against a reference with the same precision policy, loosely against f32.
    assert jnp.allclose(out, ref_mixed, atol=2e-2, rtol=2e-2), \
        "mismatch vs mixed-precision reference"
    assert jnp.allclose(out, ref_f32, atol=1e-1, rtol=1e-1), \
        "mismatch vs f32 reference"

    print("KERNEL_OK")
</pallas_src>

<mosaic_0001>
module attributes {stable_mosaic.version = 11 : i64} {
  func.func @_attention_kernel(%arg0: i32, %arg1: i32, %arg2: i32, %arg3: memref<8x32xbf16, #tpu.memory_space<vmem>>, %arg4: memref<8x32xbf16, #tpu.memory_space<vmem>>, %arg5: memref<8x32xbf16, #tpu.memory_space<vmem>>, %arg6: memref<32x32xbf16, #tpu.memory_space<vmem>>, %arg7: memref<32x32xbf16, #tpu.memory_space<vmem>>, %arg8: memref<32x32xbf16, #tpu.memory_space<vmem>>, %arg9: memref<8x8xbf16, #tpu.memory_space<vmem>>, %arg10: memref<8x32xbf16, #tpu.memory_space<vmem>>, %arg11: memref<4x8x8xbf16, #tpu.memory_space<vmem>>, %arg12: memref<4x8x1xf32, #tpu.memory_space<vmem>>, %arg13: memref<4x8x1xf32, #tpu.memory_space<vmem>>, %arg14: memref<4x8x8xf32, #tpu.memory_space<vmem>>) attributes {dimension_semantics = [#tpu.dimension_semantics<parallel>, #tpu.dimension_semantics<parallel>, #tpu.dimension_semantics<arbitrary>], iteration_bounds = array<i64: 1, 1, 1>, scalar_prefetch = 0 : i64, scratch_operands = 4 : i64, tpu.core_type = #tpu.core_type<tc>, window_params = [{transform_indices = @transform_0, window_bounds = array<i64: 8, 32>}, {transform_indices = @transform_1, window_bounds = array<i64: 8, 32>}, {transform_indices = @transform_2, window_bounds = array<i64: 8, 32>}, {transform_indices = @transform_3, window_bounds = array<i64: 32, 32>}, {transform_indices = @transform_4, window_bounds = array<i64: 32, 32>}, {transform_indices = @transform_5, window_bounds = array<i64: 32, 32>}, {transform_indices = @transform_6, window_bounds = array<i64: 8, 8>}, {transform_indices = @transform_7, window_bounds = array<i64: 8, 32>}]} {
    %c0_i32 = arith.constant 0 : i32
    %0 = arith.cmpi eq, %arg2, %c0_i32 : i32
    %1 = arith.extui %0 : i1 to i32
    %c0_i32_0 = arith.constant 0 : i32
    %2 = arith.cmpi ne, %1, %c0_i32_0 : i32
    scf.if %2 {
      %c0_38 = arith.constant 0 : index
      %c0_39 = arith.constant 0 : index
      %48 = vector.load %arg3[%c0_38, %c0_39] : memref<8x32xbf16, #tpu.memory_space<vmem>>, vector<8x32xbf16>
      %c0_40 = arith.constant 0 : index
      %c0_41 = arith.constant 0 : index
      %49 = vector.load %arg6[%c0_40, %c0_41] : memref<32x32xbf16, #tpu.memory_space<vmem>>, vector<32x32xbf16>
      %cst_42 = arith.constant dense<0.000000e+00> : vector<8x32xf32>
      %50 = tpu.matmul %48, %49, %cst_42 {dimension_numbers = #tpu.dot_dimension_numbers<[1], [1], [0], [0], [0, 0, 1, 0], [], []>} : vector<8x32xbf16>, vector<32x32xbf16>, vector<8x32xf32> -> vector<8x32xf32>
      %cst_43 = arith.constant 0.353553385 : f32
      %51 = vector.broadcast %cst_43 : f32 to vector<8x32xf32>
      %52 = arith.mulf %50, %51 : vector<8x32xf32>
      %53 = vector.shape_cast %52 : vector<8x32xf32> to vector<8x4x8xf32>
      %54 = tpu.transpose %53, [1, 0, 2] : vector<8x4x8xf32> -> vector<4x8x8xf32>
      %55 = arith.truncf %54 : vector<4x8x8xf32> to vector<4x8x8xbf16>
      %c0_44 = arith.constant 0 : index
      %c0_45 = arith.constant 0 : index
      %c0_46 = arith.constant 0 : index
      %56 = vector.load %arg11[%c0_44, %c0_45, %c0_46] : memref<4x8x8xbf16, #tpu.memory_space<vmem>>, vector<4x8x8xbf16>
      tpu.vector_store %arg11[%c0_44, %c0_45, %c0_46], %55 {strides = array<i32>} : memref<4x8x8xbf16, #tpu.memory_space<vmem>>, vector<4x8x8xbf16>,
      %cst_47 = arith.constant 0xFF800000 : f32
      %57 = vector.broadcast %cst_47 : f32 to vector<4x8x1xf32>
      %c0_48 = arith.constant 0 : index
      %c0_49 = arith.constant 0 : index
      %c0_50 = arith.constant 0 : index
      %58 = vector.load %arg12[%c0_48, %c0_49, %c0_50] : memref<4x8x1xf32, #tpu.memory_space<vmem>>, vector<4x8x1xf32>
      tpu.vector_store %arg12[%c0_48, %c0_49, %c0_50], %57 {strides = array<i32>} : memref<4x8x1xf32, #tpu.memory_space<vmem>>, vector<4x8x1xf32>,
      %cst_51 = arith.constant 0.000000e+00 : f32
      %59 = vector.broadcast %cst_51 : f32 to vector<4x8x1xf32>
      %c0_52 = arith.constant 0 : index
      %c0_53 = arith.constant 0 : index
      %c0_54 = arith.constant 0 : index
      %60 = vector.load %arg13[%c0_52, %c0_53, %c0_54] : memref<4x8x1xf32, #tpu.memory_space<vmem>>, vector<4x8x1xf32>
      tpu.vector_store %arg13[%c0_52, %c0_53, %c0_54], %59 {strides = array<i32>} : memref<4x8x1xf32, #tpu.memory_space<vmem>>, vector<4x8x1xf32>,
      %cst_55 = arith.constant 0.000000e+00 : f32
      %61 = vector.broadcast %cst_55 : f32 to vector<4x8x8xf32>
      %c0_56 = arith.constant 0 : index
      %c0_57 = arith.constant 0 : index
      %c0_58 = arith.constant 0 : index
      %62 = vector.load %arg14[%c0_56, %c0_57, %c0_58] : memref<4x8x8xf32, #tpu.memory_space<vmem>>, vector<4x8x8xf32>
      tpu.vector_store %arg14[%c0_56, %c0_57, %c0_58], %61 {strides = array<i32>} : memref<4x8x8xf32, #tpu.memory_space<vmem>>, vector<4x8x8xf32>,
    } else {
    }
    %c0 = arith.constant 0 : index
    %c0_1 = arith.constant 0 : index
    %3 = vector.load %arg4[%c0, %c0_1] : memref<8x32xbf16, #tpu.memory_space<vmem>>, vector<8x32xbf16>
    %c0_2 = arith.constant 0 : index
    %c0_3 = arith.constant 0 : index
    %4 = vector.load %arg7[%c0_2, %c0_3] : memref<32x32xbf16, #tpu.memory_space<vmem>>, vector<32x32xbf16>
    %cst = arith.constant dense<0.000000e+00> : vector<8x32xf32>
    %5 = tpu.matmul %3, %4, %cst {dimension_numbers = #tpu.dot_dimension_numbers<[1], [1], [0], [0], [0, 0, 1, 0], [], []>} : vector<8x32xbf16>, vector<32x32xbf16>, vector<8x32xf32> -> vector<8x32xf32>
    %c0_4 = arith.constant 0 : index
    %c0_5 = arith.constant 0 : index
    %6 = vector.load %arg5[%c0_4, %c0_5] : memref<8x32xbf16, #tpu.memory_space<vmem>>, vector<8x32xbf16>
    %c0_6 = arith.constant 0 : index
    %c0_7 = arith.constant 0 : index
    %7 = vector.load %arg8[%c0_6, %c0_7] : memref<32x32xbf16, #tpu.memory_space<vmem>>, vector<32x32xbf16>
    %cst_8 = arith.constant dense<0.000000e+00> : vector<8x32xf32>
    %8 = tpu.matmul %6, %7, %cst_8 {dimension_numbers = #tpu.dot_dimension_numbers<[1], [1], [0], [0], [0, 0, 1, 0], [], []>} : vector<8x32xbf16>, vector<32x32xbf16>, vector<8x32xf32> -> vector<8x32xf32>
    %9 = vector.shape_cast %5 : vector<8x32xf32> to vector<8x4x8xf32>
    %10 = tpu.transpose %9, [1, 0, 2] : vector<8x4x8xf32> -> vector<4x8x8xf32>
    %11 = arith.truncf %10 : vector<4x8x8xf32> to vector<4x8x8xbf16>
    %12 = vector.shape_cast %8 : vector<8x32xf32> to vector<8x4x8xf32>
    %13 = tpu.transpose %12, [1, 0, 2] : vector<8x4x8xf32> -> vector<4x8x8xf32>
    %14 = arith.truncf %13 : vector<4x8x8xf32> to vector<4x8x8xbf16>
    %c0_9 = arith.constant 0 : index
    %c0_10 = arith.constant 0 : index
    %c0_11 = arith.constant 0 : index
    %15 = vector.load %arg11[%c0_9, %c0_10, %c0_11] : memref<4x8x8xbf16, #tpu.memory_space<vmem>>, vector<4x8x8xbf16>
    "tpu.trace_start"() <{level = 10 : i32, message = "gqd,gkd->gqk"}> : () -> ()
    %cst_12 = arith.constant dense<0.000000e+00> : vector<4x8x8xf32>
    %16 = tpu.matmul %15, %11, %cst_12 {dimension_numbers = #tpu.dot_dimension_numbers<[2], [2], [1], [1], [0, 0, 0, 1, 1, 1], [0], [0]>} : vector<4x8x8xbf16>, vector<4x8x8xbf16>, vector<4x8x8xf32> -> vector<4x8x8xf32>
    "tpu.trace_stop"() : () -> ()
    %c0_13 = arith.constant 0 : index
    %c0_14 = arith.constant 0 : index
    %17 = vector.load %arg9[%c0_13, %c0_14] : memref<8x8xbf16, #tpu.memory_space<vmem>>, vector<8x8xbf16>
    %18 = arith.extf %17 : vector<8x8xbf16> to vector<8x8xf32>
    %19 = vector.shape_cast %18 : vector<8x8xf32> to vector<1x8x8xf32>
    %20 = vector.broadcast %19 : vector<1x8x8xf32> to vector<4x8x8xf32>
    %21 = arith.addf %16, %20 : vector<4x8x8xf32>
    %c0_15 = arith.constant 0 : index
    %c0_16 = arith.constant 0 : index
    %c0_17 = arith.constant 0 : index
    %22 = vector.load %arg12[%c0_15, %c0_16, %c0_17] : memref<4x8x1xf32, #tpu.memory_space<vmem>>, vector<4x8x1xf32>
    %cst_18 = arith.constant dense<0xFF800000> : vector<4x8xf32>
    %23 = vector.multi_reduction <maximumf>, %21, %cst_18 [2] : vector<4x8x8xf32> to vector<4x8xf32>
    %24 = vector.shape_cast %23 : vector<4x8xf32> to vector<4x8x1xf32>
    %25 = arith.maximumf %22, %24 : vector<4x8x1xf32>
    %26 = arith.subf %22, %25 : vector<4x8x1xf32>
    %27 = math.exp %26 : vector<4x8x1xf32>
    %28 = vector.broadcast %25 : vector<4x8x1xf32> to vector<4x8x8xf32>
    %29 = arith.subf %21, %28 : vector<4x8x8xf32>
    %30 = math.exp %29 : vector<4x8x8xf32>
    %c0_19 = arith.constant 0 : index
    %c0_20 = arith.constant 0 : index
    %c0_21 = arith.constant 0 : index
    %31 = vector.load %arg13[%c0_19, %c0_20, %c0_21] : memref<4x8x1xf32, #tpu.memory_space<vmem>>, vector<4x8x1xf32>
    %32 = arith.mulf %27, %31 : vector<4x8x1xf32>
    %cst_22 = arith.constant dense<0.000000e+00> : vector<4x8xf32>
    %33 = vector.multi_reduction <add>, %30, %cst_22 [2] : vector<4x8x8xf32> to vector<4x8xf32>
    %34 = vector.shape_cast %33 : vector<4x8xf32> to vector<4x8x1xf32>
    %35 = arith.addf %32, %34 : vector<4x8x1xf32>
    %c0_23 = arith.constant 0 : index
    %c0_24 = arith.constant 0 : index
    %c0_25 = arith.constant 0 : index
    %36 = vector.load %arg13[%c0_23, %c0_24, %c0_25] : memref<4x8x1xf32, #tpu.memory_space<vmem>>, vector<4x8x1xf32>
    tpu.vector_store %arg13[%c0_23, %c0_24, %c0_25], %35 {strides = array<i32>} : memref<4x8x1xf32, #tpu.memory_space<vmem>>, vector<4x8x1xf32>,
    %c0_26 = arith.constant 0 : index
    %c0_27 = arith.constant 0 : index
    %c0_28 = arith.constant 0 : index
    %37 = vector.load %arg14[%c0_26, %c0_27, %c0_28] : memref<4x8x8xf32, #tpu.memory_space<vmem>>, vector<4x8x8xf32>
    %38 = vector.broadcast %27 : vector<4x8x1xf32> to vector<4x8x8xf32>
    %39 = arith.mulf %38, %37 : vector<4x8x8xf32>
    %40 = arith.truncf %30 : vector<4x8x8xf32> to vector<4x8x8xbf16>
    "tpu.trace_start"() <{level = 10 : i32, message = "gqk,gkd->gqd"}> : () -> ()
    %cst_29 = arith.constant dense<0.000000e+00> : vector<4x8x8xf32>
    %41 = tpu.matmul %40, %14, %cst_29 {dimension_numbers = #tpu.dot_dimension_numbers<[2], [1], [1], [2], [0, 0, 0, 1, 1, 2], [0], [0]>} : vector<4x8x8xbf16>, vector<4x8x8xbf16>, vector<4x8x8xf32> -> vector<4x8x8xf32>
    "tpu.trace_stop"() : () -> ()
    %42 = arith.addf %39, %41 : vector<4x8x8xf32>
    %c0_30 = arith.constant 0 : index
    %c0_31 = arith.constant 0 : index
    %c0_32 = arith.constant 0 : index
    %43 = vector.load %arg14[%c0_30, %c0_31, %c0_32] : memref<4x8x8xf32, #tpu.memory_space<vmem>>, vector<4x8x8xf32>
    tpu.vector_store %arg14[%c0_30, %c0_31, %c0_32], %42 {strides = array<i32>} : memref<4x8x8xf32, #tpu.memory_space<vmem>>, vector<4x8x8xf32>,
    %c0_33 = arith.constant 0 : index
    %c0_34 = arith.constant 0 : index
    %c0_35 = arith.constant 0 : index
    %44 = vector.load %arg12[%c0_33, %c0_34, %c0_35] : memref<4x8x1xf32, #tpu.memory_space<vmem>>, vector<4x8x1xf32>
    tpu.vector_store %arg12[%c0_33, %c0_34, %c0_35], %25 {strides = array<i32>} : memref<4x8x1xf32, #tpu.memory_space<vmem>>, vector<4x8x1xf32>,
    %c0_i32_36 = arith.constant 0 : i32
    %45 = arith.cmpi eq, %arg2, %c0_i32_36 : i32
    %46 = arith.extui %45 : i1 to i32
    %c0_i32_37 = arith.constant 0 : i32
    %47 = arith.cmpi ne, %46, %c0_i32_37 : i32
    scf.if %47 {
      %c0_38 = arith.constant 0 : index
      %c0_39 = arith.constant 0 : index
      %c0_40 = arith.constant 0 : index
      %48 = vector.load %arg14[%c0_38, %c0_39, %c0_40] : memref<4x8x8xf32, #tpu.memory_space<vmem>>, vector<4x8x8xf32>
      %c0_41 = arith.constant 0 : index
      %c0_42 = arith.constant 0 : index
      %c0_43 = arith.constant 0 : index
      %49 = vector.load %arg13[%c0_41, %c0_42, %c0_43] : memref<4x8x1xf32, #tpu.memory_space<vmem>>, vector<4x8x1xf32>
      %50 = tpu.reciprocal %49 {approx = true} : vector<4x8x1xf32> -> vector<4x8x1xf32>
      %51 = vector.broadcast %50 : vector<4x8x1xf32> to vector<4x8x8xf32>
      %52 = arith.mulf %48, %51 : vector<4x8x8xf32>
      %53 = tpu.transpose %52, [1, 0, 2] : vector<4x8x8xf32> -> vector<8x4x8xf32>
      %54 = vector.shape_cast %53 : vector<8x4x8xf32> to vector<8x32xf32>
      %55 = arith.truncf %54 : vector<8x32xf32> to vector<8x32xbf16>
      %c0_44 = arith.constant 0 : index
      %c0_45 = arith.constant 0 : index
      %56 = vector.load %arg10[%c0_44, %c0_45] : memref<8x32xbf16, #tpu.memory_space<vmem>>, vector<8x32xbf16>
      tpu.vector_store %arg10[%c0_44, %c0_45], %55 {strides = array<i32>} : memref<8x32xbf16, #tpu.memory_space<vmem>>, vector<8x32xbf16>,
    } else {
    }
    return
  }
  func.func @transform_0(%arg0: i32, %arg1: i32, %arg2: i32) -> (i32, i32) {
    %c0_i32 = arith.constant 0 : i32
    %c0_i32_0 = arith.constant 0 : i32
    return %arg1, %c0_i32 : i32, i32
  }
  func.func @transform_1(%arg0: i32, %arg1: i32, %arg2: i32) -> (i32, i32) {
    %c0_i32 = arith.constant 0 : i32
    %c0_i32_0 = arith.constant 0 : i32
    return %arg2, %c0_i32 : i32, i32
  }
  func.func @transform_2(%arg0: i32, %arg1: i32, %arg2: i32) -> (i32, i32) {
    %c0_i32 = arith.constant 0 : i32
    %c0_i32_0 = arith.constant 0 : i32
    return %arg2, %c0_i32 : i32, i32
  }
  func.func @transform_3(%arg0: i32, %arg1: i32, %arg2: i32) -> (i32, i32) {
    %c0_i32 = arith.constant 0 : i32
    %c0_i32_0 = arith.constant 0 : i32
    return %arg0, %c0_i32 : i32, i32
  }
  func.func @transform_4(%arg0: i32, %arg1: i32, %arg2: i32) -> (i32, i32) {
    %c0_i32 = arith.constant 0 : i32
    %c0_i32_0 = arith.constant 0 : i32
    return %arg0, %c0_i32 : i32, i32
  }
  func.func @transform_5(%arg0: i32, %arg1: i32, %arg2: i32) -> (i32, i32) {
    %c0_i32 = arith.constant 0 : i32
    %c0_i32_0 = arith.constant 0 : i32
    return %arg0, %c0_i32 : i32, i32
  }
  func.func @transform_6(%arg0: i32, %arg1: i32, %arg2: i32) -> (i32, i32) {
    %c0_i32 = arith.constant 0 : i32
    return %arg1, %arg2 : i32, i32
  }
  func.func @transform_7(%arg0: i32, %arg1: i32, %arg2: i32) -> (i32, i32) {
    %c0_i32 = arith.constant 0 : i32
    return %arg1, %arg0 : i32, i32
  }
}

</mosaic_0001>

<bundles_post_ra>
// kernel: tpu_custom_call.1
= control target key start
LH: loop header
LB: loop body
LE: loop exit
PB: predicated region body
PF: predicated region fallthrough
CT: control target
= control target key end

     0   :  { %12 = vsyncpa [#allocation7], 0  ;;  %s2208_s0 = inlined_call_operand.hbm [shape: bf16[8,32], index: 0, kind: input, shape index: {}]   ;;  %s2209_s1 = inlined_call_operand.hbm [shape: bf16[8,32], index: 1, kind: input, shape index: {}]   ;;  %s2210_s2 = inlined_call_operand.hbm [shape: bf16[8,32], index: 2, kind: input, shape index: {}]   ;;  %s2211_s3 = inlined_call_operand.hbm [shape: bf16[32,32], index: 3, kind: input, shape index: {}]   ;;  %s2212_s4 = inlined_call_operand.hbm [shape: bf16[32,32], index: 4, kind: input, shape index: {}]   ;;  %s2213_s5 = inlined_call_operand.vmem [shape: bf16[32,32], index: 5, kind: input, shape index: {}]   ;;  %s2214_s6 = inlined_call_operand.vmem [shape: bf16[8,8], index: 6, kind: input, shape index: {}]   ;;  %s2215_s7 = inlined_call_operand.hbm [shape: bf16[8,32], index: 7, kind: output, shape index: {}]  }
   0x1   :  { %13 = vsyncpa [#allocation10], 0 }
   0x2   :  { %14 = vsyncpa [#allocation13], 0 }
   0x3   :  { %15 = vsyncpa [#allocation8], 0  ;;  %s1797_s24 = smov [#allocation9]   ;;  %s1798_s26 = smov [#allocation12]  }
   0x4   :  { %s32_s25 = sshll.u32 %s1797_s24, 4  ;;  %s51_s27 = sshll.u32 %s1798_s26, 4  ;;  %s33_s25 = int_to_ptr.vmem [resolvable:$true] %s32_s25  ;;  %s1857_s27 = int_to_ptr.vmem [resolvable:$true] %s51_s27 }
   0x5   :  { %s1657_s30 = scalar_lea.hbm %s2209_s1, 64 }
   0x6   :  { %p1658_p0 = scmp.ne.s32.totalorder %s2209_s1, %s1657_s30  ;;  %p1661_p1 = scmp.lt.u32.totalorder %s1657_s30, %s2209_s1 }
   0x8   :  { %p1663_p2 = pnand %p1661_p1, %p1658_p0 }
   0xa   :  { %1666 = shalt.err (!%p1663_p2)
}
   0xb   :  { %s1667_s12 = scalar_lea.vmem %s33_s25, 64  ;;  %p1672_p4 = scmp.lt.s32.totalorder %s33_s25, %s33_s25 }
   0xc   :  { %p1668_p3 = scmp.ne.s32.totalorder %s33_s25, %s1667_s12  ;;  %p1673_p5 = scmp.lt.s32.totalorder %s1667_s12, %s1667_s12 }
   0xe   :  { %p1674_p6 = por %p1673_p5, %p1672_p4 }
  0x10   :  { %p1675_p7 = pnand %p1674_p6, %p1668_p3 }
  0x12   :  { %1678 = shalt.err (!%p1675_p7)
}
  0x13   :  { %35 = dma.hbm_to_vmem [thread:$0]  %s2209_s1, 64, %s33_s25, [#allocation10]  }
  0x14   :  { %s1679_s17 = scalar_lea.hbm %s2211_s3, 256 }
  0x15   :  { %p1680_p8 = scmp.ne.s32.totalorder %s2211_s3, %s1679_s17  ;;  %p1683_p9 = scmp.lt.u32.totalorder %s1679_s17, %s2211_s3 }
  0x17   :  { %p1685_p10 = pnand %p1683_p9, %p1680_p8 }
  0x19   :  { %1688 = shalt.err (!%p1685_p10)
}
  0x1a   :  { %s1689_s22 = scalar_lea.vmem %s1857_s27, 256  ;;  %p1694_p12 = scmp.lt.s32.totalorder %s1857_s27, %s1857_s27 }
  0x1b   :  { %p1690_p11 = scmp.ne.s32.totalorder %s1857_s27, %s1689_s22  ;;  %p1695_p13 = scmp.lt.s32.totalorder %s1689_s22, %s1689_s22 }
  0x1d   :  { %p1696_p0 = por %p1695_p13, %p1694_p12 }
  0x1f   :  { %p1697_p1 = pnand %p1696_p0, %p1690_p11 }
  0x21   :  { %1700 = shalt.err (!%p1697_p1)
}
  0x22   :  { %s1799_s1 = smov 64   ;;  %s1800_s23 = smov 4  }
  0x23   :  { %57 = dma.hbm_to_vmem [thread:$0]  %s2211_s3, 256, %s1857_s27, [#allocation13], %s1799_s1, %s1799_s1, %s1800_s23  }
  0x24   :  { %s1801_s26 = smov [#allocation6]   ;;  %s1802_s29 = smov [#allocation11]  }
  0x25   :  { %s22_s28 = sshll.u32 %s1801_s26, 4  ;;  %s42_s30 = sshll.u32 %s1802_s29, 4  ;;  %s23_s28 = int_to_ptr.vmem [resolvable:$true] %s22_s28  ;;  %s43_s30 = int_to_ptr.vmem [resolvable:$true] %s42_s30 }
  0x26   :  { %s1701_s10 = scalar_lea.hbm %s2208_s0, 64 }
  0x27   :  { %p1702_p2 = scmp.ne.s32.totalorder %s2208_s0, %s1701_s10  ;;  %p1705_p3 = scmp.lt.u32.totalorder %s1701_s10, %s2208_s0 }
  0x29   :  { %p1707_p4 = pnand %p1705_p3, %p1702_p2 }
  0x2b   :  { %1710 = shalt.err (!%p1707_p4)
}
  0x2c   :  { %s1711_s3 = scalar_lea.vmem %s23_s28, 64  ;;  %p1716_p6 = scmp.lt.s32.totalorder %s23_s28, %s23_s28 }
  0x2d   :  { %p1712_p5 = scmp.ne.s32.totalorder %s23_s28, %s1711_s3  ;;  %p1717_p7 = scmp.lt.s32.totalorder %s1711_s3, %s1711_s3 }
  0x2f   :  { %p1718_p8 = por %p1717_p7, %p1716_p6 }
  0x31   :  { %p1719_p9 = pnand %p1718_p8, %p1712_p5 }
  0x33   :  { %1722 = shalt.err (!%p1719_p9)
}
  0x34   :  { %25 = dma.hbm_to_vmem [thread:$0]  %s2208_s0, 64, %s23_s28, [#allocation7]  }
  0x35   :  { %s1723_s18 = scalar_lea.hbm %s2210_s2, 64 }
  0x36   :  { %p1724_p10 = scmp.ne.s32.totalorder %s2210_s2, %s1723_s18  ;;  %p1727_p11 = scmp.lt.u32.totalorder %s1723_s18, %s2210_s2 }
  0x38   :  { %p1729_p12 = pnand %p1727_p11, %p1724_p10 }
  0x3a   :  { %1732 = shalt.err (!%p1729_p12)
}
  0x3b   :  { %s1733_s24 = scalar_lea.vmem %s43_s30, 64  ;;  %p1738_p0 = scmp.lt.s32.totalorder %s43_s30, %s43_s30 }
  0x3c   :  { %p1734_p13 = scmp.ne.s32.totalorder %s43_s30, %s1733_s24  ;;  %p1739_p1 = scmp.lt.s32.totalorder %s1733_s24, %s1733_s24 }
  0x3e   :  { %p1740_p2 = por %p1739_p1, %p1738_p0 }
  0x40   :  { %p1741_p3 = pnand %p1740_p2, %p1734_p13 }
  0x42   :  { %1744 = shalt.err (!%p1741_p3)
}
  0x43   :  { %45 = dma.hbm_to_vmem [thread:$0]  %s2210_s2, 64, %s43_s30, [#allocation10]  }
  0x44   :  { %s1803_s26 = smov [#allocation14]   ;;  %s1745_s9 = scalar_lea.hbm %s2212_s4, 256 }
  0x45   :  { %s63_s28 = sshll.u32 %s1803_s26, 4  ;;  %p1746_p4 = scmp.ne.s32.totalorder %s2212_s4, %s1745_s9  ;;  %s64_s28 = int_to_ptr.vmem [resolvable:$true] %s63_s28 }
  0x46   :  { %p1749_p5 = scmp.lt.u32.totalorder %s1745_s9, %s2212_s4 }
  0x48   :  { %p1751_p6 = pnand %p1749_p5, %p1746_p4 }
  0x4a   :  { %1754 = shalt.err (!%p1751_p6)
}
  0x4b   :  { %s1755_s14 = scalar_lea.vmem %s64_s28, 256  ;;  %p1760_p8 = scmp.lt.s32.totalorder %s64_s28, %s64_s28 }
  0x4c   :  { %p1756_p7 = scmp.ne.s32.totalorder %s64_s28, %s1755_s14  ;;  %p1761_p9 = scmp.lt.s32.totalorder %s1755_s14, %s1755_s14 }
  0x4e   :  { %p1762_p10 = por %p1761_p9, %p1760_p8 }
  0x50   :  { %p1763_p11 = pnand %p1762_p10, %p1756_p7 }
  0x52   :  { %1766 = shalt.err (!%p1763_p11)
}
  0x53   :  { %69 = dma.hbm_to_vmem [thread:$0]  %s2212_s4, 256, %s64_s28, [#allocation13], %s1799_s1, %s1799_s1, %s1800_s23  }
  0x54   :  { %1789 = dma.done.wait [#allocation7], 64  }
  0x55   :  { %1790 = vsyncadd [#allocation7], 4294967232 }
  0x56   :  { %1791 = dma.done.wait [#allocation10], 128  }
  0x57   :  { %1792 = vsyncadd [#allocation10], 4294967168 }
  0x58   :  { %1793 = dma.done.wait [#allocation13], 512  }
  0x59   :  { %1794 = vsyncadd [#allocation13], 4294966784  ;;  %v1804_v0 = vmov 0.0   ;;  %vm1805_vm0 = vmmov 0   ;;  %vm109_vm1 = vcmask 261120   ;;  %v1627_v1 = vld [vmem:[#allocation12] sm:$0xff]   ;;  %v175_v27 = vlaneseq }
  0x5a   :  { %1533 = vmatprep.subr.bf16.mxu0 %v1804_v0  ;;  %1541 = vmatprep.subr.bf16.mxu1 %v1804_v0  ;;  %v1628_v2 = vld [vmem:[#allocation14] sm:$0xff]   ;;  %v114_v3 = vsel %vm109_vm1, %v1627_v1, 0  ;;  %v1629_v5 = vld [vmem:[#allocation12 + $0x8] sm:$0xff]   ;;  %v1630_v6 = vld [vmem:[#allocation14 + $0x8] sm:$0xff]   ;;  %s1806_s23 = smov 120   ;;  %s1807_s3 = smov 104  }
  0x5b   :  { %1537 = vmatprep.mubr.msk.bf16.mxu0 %vm1805_vm0, %v1804_v0  ;;  %1545 = vmatprep.mubr.msk.bf16.mxu1 %vm1805_vm0, %v1804_v0  ;;  %v349_v4 = vsel %vm109_vm1, %v1628_v2, 0  ;;  %v117_v7 = vsel %vm109_vm1, %v1629_v5, 0  ;;  %v352_v8 = vsel %vm109_vm1, %v1630_v6, 0  ;;  %v94_v9 = vld [vmem:[#allocation6] sm:$0xf]  ;;  %s1808_s27 = smov 112  }
  0x5c   :  { %1534 = vmatpush3.bf16.xpose.msra.mxu0 %v114_v3  ;;  %1542 = vmatpush3.bf16.xpose.msra.mxu1 %v349_v4  ;;  %v329_v10 = vld [vmem:[#allocation9] sm:$0xf]  ;;  %v1632_v22 = vld [vmem:[%s2213_s5 + $0x8] sm:$0xff]   ;;  %vm324_vm2 = vcmask 64512   ;;  %v1809_v25 = vmov 1983009808  }
  0x5d   :  { %1535 = vmatprep.subr.bf16.mxu0 %v1804_v0  ;;  %1543 = vmatprep.subr.bf16.mxu1 %v1804_v0  ;;  %v1631_v15 = vld [vmem:[%s2213_s5] sm:$0xff]   ;;  %v416_v23 = vsel %vm109_vm1, %v1632_v22, 0  ;;  %325 = vst.msk [vmem:[#allocation5] sm:$0xff] %vm324_vm2, %v1804_v0  ;;  %326 = vst.msk [vmem:[#allocation5 + $0x8] sm:$0xff] %vm324_vm2, %v1804_v0  ;;  %v394_v24 = vld [vmem:[#allocation11] sm:$0xf]  ;;  %v173_v26 = vunpack.c.l.s4 %v1809_v25 }
  0x5e   :  { %v413_v20 = vsel %vm109_vm1, %v1631_v15, 0  ;;  %327 = vst.msk [vmem:[#allocation5 + $0x10] sm:$0xff] %vm324_vm2, %v1804_v0  ;;  %328 = vst.msk [vmem:[#allocation5 + $0x18] sm:$0xff] %vm324_vm2, %v1804_v0  ;;  %v1810_v28 = vmov 1934713408   ;;  %v176_v32 = vshrl.u32 %v175_v27, 7 }
  0x5f   :  { %v205_v29 = vunpack.c.l.s4 %v1810_v28  ;;  %v174_v31 = vunpack.c.0.s8 %v173_v26  ;;  %vm310_vm3 = vcmask 60416   ;;  %vm315_vm4 = vcmask 7168   ;;  %s1814_s18 = smov 8   ;;  %s1815_s19 = smov 24  }
  0x60   :  { %320 = vst.msk [vmem:[#allocation4] sm:$0xff] %vm315_vm4, %v1804_v0  ;;  %321 = vst.msk [vmem:[#allocation4 + $0x8] sm:$0xff] %vm315_vm4, %v1804_v0  ;;  %vm1077_vm5 = vcmask 1043456   ;;  %vm1459_vm6 = vcmask 130048   ;;  %vm1461_vm7 = vcmask 195584   ;;  %s1816_s20 = smov [#allocation15]  }
  0x61   :  { %v206_v34 = vunpack.c.0.s8 %v205_v29  ;;  %v1982_v35 = vsub.s32 %v174_v31, %v176_v32  ;;  %322 = vst.msk [vmem:[#allocation4 + $0x10] sm:$0xff] %vm315_vm4, %v1804_v0  ;;  %323 = vst.msk [vmem:[#allocation4 + $0x18] sm:$0xff] %vm315_vm4, %v1804_v0  ;;  %s1472_s21 = sshll.u32 %s1816_s20, 4  ;;  %vm1464_vm8 = vcmask 257024   ;;  %s1473_s21 = int_to_ptr.vmem [resolvable:$true] %s1472_s21 }
  0x62   :  { %s1767_s22 = scalar_lea.vmem %s1473_s21, 64  ;;  %p1772_p13 = scmp.lt.s32.totalorder %s1473_s21, %s1473_s21 }
  0x63   :  { %v1984_v42 = vsub.s32 %v206_v34, %v176_v32  ;;  %p1768_p12 = scmp.ne.s32.totalorder %s1473_s21, %s1767_s22  ;;  %p1773_p0 = scmp.lt.s32.totalorder %s1767_s22, %s1767_s22 }
  0x64   :  { %1536 = vmatpush3.bf16.xpose.msra.mxu0 %v117_v7  ;;  %1544 = vmatpush3.bf16.xpose.msra.mxu1 %v352_v8 }
  0x65   :  { %1549 = vmatprep.subr.bf16.mxu0 %v1804_v0  ;;  %1557 = vmatprep.subr.bf16.mxu1 %v1804_v0  ;;  %p1774_p1 = por %p1773_p0, %p1772_p13 }
  0x67   :  { %p1775_p2 = pnand %p1774_p1, %p1768_p12 }
  0x6b   :  { %1538 = vmatmul.mubr.msk.bf16.vlgmr.msra.gmra.mrb[0].mxu0 %vm109_vm1, %v94_v9  ;;  %1546 = vmatmul.mubr.msk.bf16.vlgmr.msra.gmra.mrb[0].mxu1 %vm109_vm1, %v329_v10 }
  0x6c   :  { %1553 = vmatprep.mubr.msk.bf16.mxu0 %vm1805_vm0, %v1804_v0  ;;  %1559 = vmatprep.mubr.msk.bf16.mxu1 %vm1805_vm0, %v1804_v0 }
  0x6d   :  { %1550 = vmatpush3.bf16.xpose.msra.mxu0 %v413_v20 }
  0x6e   :  { %1551 = vmatprep.subr.bf16.mxu0 %v1804_v0 }
  0x75   :  { %1552 = vmatpush3.bf16.xpose.msra.mxu0 %v416_v23 }
  0x76   :  { %1569 = vmatprep.subr.bf16.mxu0 %v1804_v0 }
  0x7c   :  { %1554 = vmatmul.mubr.msk.bf16.vlgmr.msra.gmra.mrb[4].mxu0 %vm109_vm1, %v394_v24 }
  0x7d   :  { %1571 = vmatprep.mubr.msk.bf16.mxu0 %vm1805_vm0, %v1804_v0 }
 0x13e   :  { %v153_v11 = vpop.f32.mrb[0].mxu0  ;;  %v1950_v13 = vpop.f32.mrb[0].mxu1 }
 0x13f   :  { %v159_v12 = vmul.f32 0.35355338, %v153_v11  ;;  %v1539_v14 = vpop.f32.mrb[1].mxu0  ;;  %459 = vrot.lane.b32.xlu1 %v1950_v13, %s1806_s23  ;;  %v1547_v16 = vpop.f32.mrb[1].mxu1 }
 0x140   :  { %v156_v17 = vpop.f32.mrb[2].mxu0  ;;  %v391_v18 = vpop.f32.mrb[2].mxu1 }
 0x141   :  { %161 = vrot.lane.b32.xlu0 %v159_v12, %s1806_s23  ;;  %v1540_v19 = vpop.f32.mrb[3].mxu0  ;;  %v1548_v21 = vpop.f32.mrb[3].mxu1 }
 0x143   :  { %167 = vrot.lane.b32.xlu1 %v159_v12, %s1807_s3 }
 0x145   :  { %164 = vrot.lane.b32.xlu0 %v159_v12, %s1808_s27 }
 0x147   :  { %465 = vrot.lane.b32.xlu1 %v1950_v13, %s1807_s3 }
 0x149   :  { %462 = vrot.lane.b32.xlu0 %v1950_v13, %s1808_s27 }
 0x1b1   :  { %v460_v30 = vpop.permute.xlu1 %459 }
 0x1b3   :  { %v162_v33 = vpop.permute.xlu0 %161 }
 0x1b5   :  { %v168_v36 = vpop.permute.xlu1 %167 }
 0x1b6   :  { %v186_v37 = vcombine.low %v162_v33, %v168_v36  ;;  %v187_v38 = vcombine.high %v162_v33, %v168_v36 }
 0x1b7   :  { %v165_v39 = vpop.permute.xlu0 %164 }
 0x1b8   :  { %v170_v40 = vcombine.low %v159_v12, %v165_v39  ;;  %v171_v41 = vcombine.high %v159_v12, %v165_v39  ;;  %v194_v43 = vrot.slane %v186_v37, %v1982_v35  ;;  %v201_v44 = vrot.slane %v187_v38, %v1982_v35 }
 0x1b9   :  { %v466_v47 = vpop.permute.xlu1 %465 }
 0x1ba   :  { %v178_v45 = vrot.slane %v170_v40, %v1982_v35  ;;  %v185_v46 = vrot.slane %v171_v41, %v1982_v35  ;;  %v484_v48 = vcombine.low %v460_v30, %v466_v47  ;;  %v485_v49 = vcombine.high %v460_v30, %v466_v47 }
 0x1bb   :  { %v463_v50 = vpop.permute.xlu0 %462 }
 0x1bc   :  { %v202_v51 = vcombine.low %v178_v45, %v194_v43  ;;  %v203_v52 = vcombine.high %v178_v45, %v194_v43  ;;  %v218_v53 = vcombine.low %v185_v46, %v201_v44  ;;  %v219_v54 = vcombine.high %v185_v46, %v201_v44 }
 0x1bd   :  { %v468_v55 = vcombine.low %v1950_v13, %v463_v50  ;;  %v469_v56 = vcombine.high %v1950_v13, %v463_v50  ;;  %v492_v61 = vrot.slane %v484_v48, %v1982_v35  ;;  %v499_v62 = vrot.slane %v485_v49, %v1982_v35 }
 0x1be   :  { %v210_v57 = vrot.slane %v202_v51, %v1984_v42  ;;  %v217_v58 = vrot.slane %v203_v52, %v1984_v42  ;;  %v226_v59 = vrot.slane %v218_v53, %v1984_v42  ;;  %v233_v60 = vrot.slane %v219_v54, %v1984_v42 }
 0x1bf   :  { %v476_v63 = vrot.slane %v468_v55, %v1982_v35  ;;  %v483_v1 = vrot.slane %v469_v56, %v1982_v35 }
 0x1c0   :  { %v238_v2 = vcombine.low %v210_v57, %v217_v58  ;;  %v1486_v3 = vcombine.high %v210_v57, %v217_v58  ;;  %v254_v4 = vcombine.low %v226_v59, %v233_v60  ;;  %v1487_v5 = vcombine.high %v226_v59, %v233_v60 }
 0x1c1   :  { %v500_v6 = vcombine.low %v476_v63, %v492_v61  ;;  %v501_v7 = vcombine.high %v476_v63, %v492_v61  ;;  %v516_v8 = vcombine.low %v483_v1, %v499_v62  ;;  %v517_v9 = vcombine.high %v483_v1, %v499_v62 }
 0x1c2   :  { %v245_v10 = vrot.slane %v238_v2, %v1982_v35  ;;  %v253_v11 = vrot.slane %v1486_v3, %v1982_v35  ;;  %v261_v12 = vrot.slane %v254_v4, %v1982_v35  ;;  %v269_v13 = vrot.slane %v1487_v5, %v1982_v35  ;;  %v2044_v5 = vpop.f32.mrb[4].mxu0 }
 0x1c3   :  { %v508_v14 = vrot.slane %v500_v6, %v1984_v42  ;;  %v515_v15 = vrot.slane %v501_v7, %v1984_v42  ;;  %v524_v16 = vrot.slane %v516_v8, %v1984_v42  ;;  %v531_v17 = vrot.slane %v517_v9, %v1984_v42  ;;  %v1555_v6 = vpop.f32.mrb[5].mxu0 }
 0x1c4   :  { %v270_v18 = vcombine.low %v245_v10, %v253_v11  ;;  %v271_v19 = vcombine.high %v245_v10, %v253_v11  ;;  %v286_v20 = vcombine.low %v261_v12, %v269_v13  ;;  %v287_v21 = vcombine.high %v261_v12, %v269_v13  ;;  %v455_v7 = vpop.f32.mrb[6].mxu0  ;;  %v762_v10 = vld [vmem:[%s2214_s6] sm:$0xf]  ;;  %s1813_s6 = smov 16  }
 0x1c5   :  { %v536_v22 = vcombine.low %v508_v14, %v515_v15  ;;  %v1494_v23 = vcombine.high %v508_v14, %v515_v15  ;;  %v552_v24 = vcombine.low %v524_v16, %v531_v17  ;;  %v1495_v25 = vcombine.high %v524_v16, %v531_v17  ;;  %v1556_v8 = vpop.f32.mrb[7].mxu0 }
 0x1c6   :  { %v278_v26 = vrot.slane %v270_v18, %v1984_v42  ;;  %v285_v27 = vrot.slane %v271_v19, %v1984_v42  ;;  %v294_v28 = vrot.slane %v286_v20, %v1984_v42  ;;  %v301_v29 = vrot.slane %v287_v21, %v1984_v42 }
 0x1c7   :  { %v543_v30 = vrot.slane %v536_v22, %v1982_v35  ;;  %v551_v31 = vrot.slane %v1494_v23, %v1982_v35  ;;  %v559_v32 = vrot.slane %v552_v24, %v1982_v35  ;;  %v567_v33 = vrot.slane %v1495_v25, %v1982_v35 }
 0x1c8   :  { %v302_v34 = vcombine.low %v278_v26, %v294_v28  ;;  %v303_v36 = vcombine.high %v278_v26, %v294_v28  ;;  %v304_v37 = vcombine.low %v285_v27, %v301_v29  ;;  %v305_v38 = vcombine.high %v285_v27, %v301_v29 }
 0x1c9   :  { %v568_v39 = vcombine.low %v543_v30, %v551_v31  ;;  %v584_v40 = vcombine.low %v559_v32, %v567_v33  ;;  %v569_v41 = vcombine.high %v543_v30, %v551_v31  ;;  %v585_v43 = vcombine.high %v559_v32, %v567_v33 }
 0x1ca   :  { %v306_v44 = vpack.c.bf16 %v302_v34, %v302_v34  ;;  %v307_v45 = vpack.c.bf16 %v303_v36, %v303_v36  ;;  %v308_v46 = vpack.c.bf16 %v304_v37, %v304_v37  ;;  %v309_v47 = vpack.c.bf16 %v305_v38, %v305_v38 }
 0x1cb   :  { %v576_v48 = vrot.slane %v568_v39, %v1984_v42  ;;  %v592_v49 = vrot.slane %v584_v40, %v1984_v42  ;;  %v583_v50 = vrot.slane %v569_v41, %v1984_v42  ;;  %v599_v51 = vrot.slane %v585_v43, %v1984_v42 }
 0x1cc   :  { %311 = vst.msk [vmem:[#allocation2] sm:$0xf] %vm310_vm3, %v306_v44  ;;  %312 = vst.msk [vmem:[#allocation2 + $0x4] sm:$0xf] %vm310_vm3, %v307_v45  ;;  %v1811_v9 = vmov -inf   ;;  %v763_v11 = vunpack.c.l.bf16 %v762_v10  ;;  %v1812_v37 = vmov 0  }
 0x1cd   :  { %313 = vst.msk [vmem:[#allocation2 + $0x8] sm:$0xf] %vm310_vm3, %v308_v46  ;;  %314 = vst.msk [vmem:[#allocation2 + $0xc] sm:$0xf] %vm310_vm3, %v309_v47  ;;  %v600_v52 = vcombine.low %v576_v48, %v592_v49  ;;  %v602_v53 = vcombine.low %v583_v50, %v599_v51  ;;  %v601_v58 = vcombine.high %v576_v48, %v592_v49  ;;  %1625 = vset.pattern.permute.xlu1 %v1812_v37 }
 0x1ce   :  { %v603_v63 = vcombine.high %v583_v50, %v599_v51  ;;  %316 = vst.msk [vmem:[#allocation3] sm:$0xff] %vm315_vm4, %v1811_v9  ;;  %317 = vst.msk [vmem:[#allocation3 + $0x8] sm:$0xff] %vm315_vm4, %v1811_v9  ;;  %1626 = vset.pattern.permute.xlu0 %v1812_v37 }
 0x1cf   :  { %v604_v54 = vpack.c.bf16 %v600_v52, %v600_v52  ;;  %v606_v55 = vpack.c.bf16 %v602_v53, %v602_v53  ;;  %v605_v59 = vpack.c.bf16 %v601_v58, %v601_v58  ;;  %318 = vst.msk [vmem:[#allocation3 + $0x10] sm:$0xff] %vm315_vm4, %v1811_v9  ;;  %319 = vst.msk [vmem:[#allocation3 + $0x18] sm:$0xff] %vm315_vm4, %v1811_v9 }
 0x1d0   :  { %v607_v1 = vpack.c.bf16 %v603_v63, %v603_v63 }
 0x1d1   :  { %v769_v56 = vsel %vm324_vm2, %v604_v54, 0  ;;  %v861_v57 = vsel %vm324_vm2, %v606_v55, 0  ;;  %v815_v62 = vsel %vm324_vm2, %v605_v59, 0 }
 0x1d2   :  { %1558 = vmatpush3.bf16.xpose.msra.mxu1 %v769_v56  ;;  %1570 = vmatpush3.bf16.xpose.msra.mxu0 %v861_v57  ;;  %v907_v3 = vsel %vm324_vm2, %v607_v1, 0 }
 0x1d3   :  { %1563 = vmatprep.subr.bf16.mxu1 %v1804_v0  ;;  %1581 = vmatprep.subr.bf16.mxu0 %v1804_v0  ;;  %v758_v60 = vld [vmem:[#allocation2] sm:$0xf]  ;;  %v759_v2 = vld [vmem:[#allocation2 + $0x4] sm:$0xf] }
 0x1d4   :  { %v760_v61 = vld [vmem:[#allocation2 + $0x8] sm:$0xf]  ;;  %v761_v4 = vld [vmem:[#allocation2 + $0xc] sm:$0xf] }
 0x1d5   :  { %v2083_v38 = vld [vmem:[#allocation3] sm:$0xff]  ;;  %v2098_v46 = vld [vmem:[#allocation3 + $0x8] sm:$0xff] }
 0x1d6   :  { %v2088_v41 = vld [vmem:[#allocation3 + $0x10] sm:$0xff]  ;;  %v2113_v52 = vld [vmem:[#allocation3 + $0x18] sm:$0xff] }
 0x1d9   :  { %1560 = vmatmul.mubr.msk.bf16.vlgmr.msra.gmra.mrb[4].mxu1 %vm324_vm2, %v758_v60  ;;  %1572 = vmatmul.mubr.msk.bf16.vlgmr.msra.gmra.mrb[8].mxu0 %vm324_vm2, %v760_v61 }
 0x1da   :  { %1564 = vmatpush3.bf16.xpose.msra.mxu1 %v815_v62  ;;  %1565 = vmatprep.mubr.msk.bf16.mxu1 %vm1805_vm0, %v1804_v0 }
 0x1db   :  { %1575 = vmatprep.subr.bf16.mxu1 %v1804_v0  ;;  %1583 = vmatprep.mubr.msk.bf16.mxu0 %vm1805_vm0, %v1804_v0 }
 0x1e1   :  { %1566 = vmatmul.mubr.msk.bf16.vlgmr.msra.gmra.mrb[8].mxu1 %vm324_vm2, %v759_v2 }
 0x1e2   :  { %1576 = vmatpush3.bf16.xpose.msra.mxu1 %v907_v3  ;;  %1577 = vmatprep.mubr.msk.bf16.mxu1 %vm1805_vm0, %v1804_v0 }
 0x1e3   :  { %1587 = vmatprep.subr.bf16.mxu1 %v1804_v0 }
 0x1e9   :  { %1578 = vmatmul.mubr.msk.bf16.vlgmr.msra.gmra.mrb[12].mxu1 %vm324_vm2, %v761_v4 }
 0x1ea   :  { %1589 = vmatprep.mubr.msk.bf16.mxu1 %vm1805_vm0, %v1804_v0 }
 0x2ac   :  { %v805_v12 = vpop.f32.mrb[4].mxu1  ;;  %v897_v13 = vpop.f32.mrb[8].mxu0 }
 0x2ad   :  { %v2061_v14 = vadd.f32 %v805_v12, %v763_v11  ;;  %v1561_v15 = vpop.f32.mrb[5].mxu1  ;;  %v1573_v16 = vpop.f32.mrb[9].mxu0  ;;  %v2063_v19 = vadd.f32 %v897_v13, %v763_v11 }
 0x2ae   :  { %v808_v17 = vpop.f32.mrb[6].mxu1  ;;  %v900_v18 = vpop.f32.mrb[10].mxu0 }
 0x2af   :  { %v1562_v20 = vpop.f32.mrb[7].mxu1  ;;  %v1574_v21 = vpop.f32.mrb[11].mxu0  ;;  %v953_v22 = vsel %vm324_vm2, %v2061_v14, -inf  ;;  %v959_v23 = vsel %vm324_vm2, %v2063_v19, -inf }
 0x2b0   :  { %954 = vmax.xlane.f32.xlu0 %v953_v22 }
 0x2b4   :  { %v851_v24 = vpop.f32.mrb[8].mxu1  ;;  %960 = vmax.xlane.f32.xlu0 %v959_v23 }
 0x2b5   :  { %v2069_v25 = vadd.f32 %v851_v24, %v763_v11  ;;  %v1567_v26 = vpop.f32.mrb[9].mxu1 }
 0x2b6   :  { %v854_v27 = vpop.f32.mrb[10].mxu1 }
 0x2b7   :  { %v1568_v28 = vpop.f32.mrb[11].mxu1  ;;  %v956_v29 = vsel %vm324_vm2, %v2069_v25, -inf }
 0x2b8   :  { %957 = vmax.xlane.f32.xlu1 %v956_v29 }
 0x2bc   :  { %v943_v30 = vpop.f32.mrb[12].mxu1 }
 0x2bd   :  { %v2073_v31 = vadd.f32 %v943_v30, %v763_v11  ;;  %v1579_v32 = vpop.f32.mrb[13].mxu1 }
 0x2be   :  { %v946_v33 = vpop.f32.mrb[14].mxu1 }
 0x2bf   :  { %v1580_v34 = vpop.f32.mrb[15].mxu1  ;;  %v962_v36 = vsel %vm324_vm2, %v2073_v31, -inf }
 0x2c0   :  { %963 = vmax.xlane.f32.xlu0 %v962_v36 }
 0x2c9   :  { %609 = vrot.lane.b32.xlu1 %v2044_v5, %s1806_s23 }
 0x2cd   :  { %615 = vrot.lane.b32.xlu1 %v2044_v5, %s1807_s3 }
 0x2d6   :  { %612 = vrot.lane.b32.xlu0 %v2044_v5, %s1808_s27 }
 0x33d   :  { %v955_v39 = vpop.xlane.xlu0 %954 }
 0x33e   :  { %v2086_v40 = vmax.f32 %v2083_v38, %v955_v39 }
 0x340   :  { %v969_v43 = vsub.f32 %v2083_v38, %v2086_v40  ;;  %1267 = vst.msk [vmem:[#allocation3] sm:$0xff] %vm315_vm4, %v2086_v40  ;;  %983 = vperm.xlu1 %1625, %v2086_v40  }
 0x341   :  { %v961_v44 = vpop.xlane.xlu0 %960 }
 0x342   :  { %v2096_v45 = vmax.f32 %v2088_v41, %v961_v44 }
 0x344   :  { %v971_v47 = vsub.f32 %v2088_v41, %v2096_v45  ;;  %1269 = vst.msk [vmem:[#allocation3 + $0x10] sm:$0xff] %vm315_vm4, %v2096_v45  ;;  %993 = vperm.xlu1 %1625, %v2096_v45  }
 0x345   :  { %v958_v48 = vpop.xlane.xlu1 %957 }
 0x346   :  { %v2106_v49 = vmax.f32 %v2098_v46, %v958_v48 }
 0x348   :  { %v970_v50 = vsub.f32 %v2098_v46, %v2106_v49  ;;  %1268 = vst.msk [vmem:[#allocation3 + $0x8] sm:$0xff] %vm315_vm4, %v2106_v49  ;;  %988 = vperm.xlu0 %1626, %v2106_v49   ;;  %v1014_v46 = vld [vmem:[#allocation4 + $0x8] sm:$0xff] }
 0x349   :  { %v610_v51 = vpop.permute.xlu1 %609 }
 0x34d   :  { %v616_v53 = vpop.permute.xlu1 %615  ;;  %v964_v54 = vpop.xlane.xlu0 %963 }
 0x34e   :  { %v2116_v55 = vmax.f32 %v2113_v52, %v964_v54  ;;  %v634_v56 = vcombine.low %v610_v51, %v616_v53  ;;  %v635_v57 = vcombine.high %v610_v51, %v616_v53 }
 0x350   :  { %v972_v58 = vsub.f32 %v2113_v52, %v2116_v55  ;;  %1270 = vst.msk [vmem:[#allocation3 + $0x18] sm:$0xff] %vm315_vm4, %v2116_v55  ;;  %998 = vperm.xlu1 %1625, %v2116_v55   ;;  %v642_v62 = vrot.slane %v634_v56, %v1982_v35  ;;  %v649_v63 = vrot.slane %v635_v57, %v1982_v35 }
 0x351   :  { %v613_v59 = vpop.permute.xlu0 %612 }
 0x352   :  { %v618_v60 = vcombine.low %v2044_v5, %v613_v59  ;;  %v619_v61 = vcombine.high %v2044_v5, %v613_v59  ;;  %v979_v38 = vmul.f32 1.442695, %v972_v58 }
 0x354   :  { %v626_v1 = vrot.slane %v618_v60, %v1982_v35  ;;  %v633_v2 = vrot.slane %v619_v61, %v1982_v35 }
 0x356   :  { %v650_v3 = vcombine.low %v626_v1, %v642_v62  ;;  %v651_v4 = vcombine.high %v626_v1, %v642_v62  ;;  %v666_v6 = vcombine.low %v633_v2, %v649_v63  ;;  %v667_v7 = vcombine.high %v633_v2, %v649_v63 }
 0x358   :  { %v658_v8 = vrot.slane %v650_v3, %v1984_v42  ;;  %v665_v9 = vrot.slane %v651_v4, %v1984_v42  ;;  %v674_v10 = vrot.slane %v666_v6, %v1984_v42  ;;  %v681_v5 = vrot.slane %v667_v7, %v1984_v42 }
 0x35a   :  { %v686_v11 = vcombine.low %v658_v8, %v665_v9  ;;  %v1496_v12 = vcombine.high %v658_v8, %v665_v9  ;;  %v702_v13 = vcombine.low %v674_v10, %v681_v5  ;;  %v1497_v15 = vcombine.high %v674_v10, %v681_v5 }
 0x35c   :  { %v693_v16 = vrot.slane %v686_v11, %v1982_v35  ;;  %v701_v17 = vrot.slane %v1496_v12, %v1982_v35  ;;  %v709_v18 = vrot.slane %v702_v13, %v1982_v35  ;;  %v717_v20 = vrot.slane %v1497_v15, %v1982_v35 }
 0x35d   :  { %v977_v13 = vmul.f32 1.442695, %v971_v47  ;;  %v1013_v47 = vld [vmem:[#allocation4] sm:$0xff] }
 0x35e   :  { %v718_v21 = vcombine.low %v693_v16, %v701_v17  ;;  %v734_v22 = vcombine.low %v709_v18, %v717_v20  ;;  %v719_v23 = vcombine.high %v693_v16, %v701_v17  ;;  %v735_v24 = vcombine.high %v709_v18, %v717_v20  ;;  %v1015_v20 = vld [vmem:[#allocation4 + $0x10] sm:$0xff] }
 0x360   :  { %v726_v26 = vrot.slane %v718_v21, %v1984_v42  ;;  %v742_v27 = vrot.slane %v734_v22, %v1984_v42  ;;  %v733_v28 = vrot.slane %v719_v23, %v1984_v42  ;;  %v749_v29 = vrot.slane %v735_v24, %v1984_v42  ;;  %v1016_v24 = vld [vmem:[#allocation4 + $0x18] sm:$0xff] }
 0x362   :  { %v750_v30 = vcombine.low %v726_v26, %v742_v27  ;;  %v751_v32 = vcombine.high %v726_v26, %v742_v27  ;;  %v752_v33 = vcombine.low %v733_v28, %v749_v29  ;;  %v753_v34 = vcombine.high %v733_v28, %v749_v29 }
 0x364   :  { %v754_v36 = vpack.c.bf16 %v750_v30, %v750_v30  ;;  %v755_v37 = vpack.c.bf16 %v751_v32, %v751_v32  ;;  %v756_v39 = vpack.c.bf16 %v752_v33, %v752_v33  ;;  %v757_v44 = vpack.c.bf16 %v753_v34, %v753_v34 }
 0x366   :  { %v1079_v48 = vsel %vm1077_vm5, %v754_v36, 0  ;;  %v1125_v51 = vsel %vm1077_vm5, %v755_v37, 0  ;;  %v1171_v53 = vsel %vm1077_vm5, %v756_v39, 0  ;;  %v1217_v54 = vsel %vm1077_vm5, %v757_v44, 0  ;;  %v1042_v39 = vld [vmem:[#allocation5] sm:$0xff] }
 0x367   :  { %1582 = vmatpush3.bf16.msra.mxu0 %v1079_v48  ;;  %1588 = vmatpush3.bf16.msra.mxu1 %v1125_v51 }
 0x368   :  { %1593 = vmatprep.subr.bf16.mxu0 %v1804_v0  ;;  %1599 = vmatprep.subr.bf16.mxu1 %v1804_v0 }
 0x3bf   :  { %v984_v56 = vpop.permute.xlu1 %983 }
 0x3c0   :  { %v1001_v57 = vsub.f32 %v2061_v14, %v984_v56 }
 0x3c2   :  { %v1005_v59 = vmul.f32 1.442695, %v1001_v57 }
 0x3c3   :  { %v994_v60 = vpop.permute.xlu1 %993 }
 0x3c4   :  { %1633 = vpow2.f32 %v1005_v59  ;;  %v1003_v61 = vsub.f32 %v2063_v19, %v994_v60  ;;  %v1044_v59 = vld [vmem:[#allocation5 + $0x10] sm:$0xff] }
 0x3c6   :  { %v1009_v62 = vmul.f32 1.442695, %v1003_v61  ;;  %v1043_v61 = vld [vmem:[#allocation5 + $0x8] sm:$0xff] }
 0x3c7   :  { %v989_v63 = vpop.permute.xlu0 %988 }
 0x3c8   :  { %1635 = vpow2.f32 %v1009_v62  ;;  %v1002_v1 = vsub.f32 %v2069_v25, %v989_v63 }
 0x3ca   :  { %v1007_v2 = vmul.f32 1.442695, %v1002_v1 }
 0x3cc   :  { %1637 = vpow2.f32 %v1007_v2 }
 0x3ce   :  { %v1634_v3 = vpop.eup %1633 }
 0x3cf   :  { %v999_v4 = vpop.permute.xlu1 %998  ;;  %v1021_v6 = vsel %vm324_vm2, %v1634_v3, 0.0  ;;  %v1070_v7 = vpack.c.bf16 %v1634_v3, %v1634_v3 }
 0x3d0   :  { %v1004_v8 = vsub.f32 %v2073_v31, %v999_v4  ;;  %1022 = vadd.xlane.f32.xlu0 %v1021_v6  ;;  %v973_v31 = vmul.f32 1.442695, %v969_v43 }
 0x3d1   :  { %1584 = vmatmul.mubr.msk.bf16.vlgmr.msra.gmra.mrb[12].mxu0 %vm324_vm2, %v1070_v7 }
 0x3d2   :  { %v1636_v14 = vpop.eup %1635  ;;  %v1011_v9 = vmul.f32 1.442695, %v1004_v8  ;;  %1594 = vmatpush3.bf16.msra.mxu0 %v1171_v53  ;;  %1595 = vmatprep.mubr.msk.bf16.mxu0 %vm1805_vm0, %v1804_v0 }
 0x3d3   :  { %v1027_v19 = vsel %vm324_vm2, %v1636_v14, 0.0  ;;  %v1072_v11 = vpack.c.bf16 %v1636_v14, %v1636_v14 }
 0x3d4   :  { %1639 = vpow2.f32 %v1011_v9  ;;  %1028 = vadd.xlane.f32.xlu0 %v1027_v19 }
 0x3d5   :  { %1641 = vpow2.f32 %v973_v31 }
 0x3d6   :  { %v1638_v25 = vpop.eup %1637  ;;  %1643 = vpow2.f32 %v977_v13 }
 0x3d7   :  { %v1024_v10 = vsel %vm324_vm2, %v1638_v25, 0.0  ;;  %v1071_v5 = vpack.c.bf16 %v1638_v25, %v1638_v25  ;;  %1645 = vpow2.f32 %v979_v38 }
 0x3d8   :  { %1025 = vadd.xlane.f32.xlu1 %v1024_v10  ;;  %v1045_v10 = vld [vmem:[#allocation5 + $0x18] sm:$0xff] }
 0x3d9   :  { %1590 = vmatmul.mubr.msk.bf16.vlgmr.msra.gmra.mrb[16].mxu1 %vm324_vm2, %v1071_v5  ;;  %1596 = vmatmul.mubr.msk.bf16.vlgmr.msra.gmra.mrb[16].mxu0 %vm324_vm2, %v1072_v11 }
 0x3da   :  { %1600 = vmatpush3.bf16.msra.mxu1 %v1217_v54  ;;  %1601 = vmatprep.mubr.msk.bf16.mxu1 %vm1805_vm0, %v1804_v0  ;;  %v975_v0 = vmul.f32 1.442695, %v970_v50 }
 0x3dc   :  { %1647 = vpow2.f32 %v975_v0 }
 0x3de   :  { %v1640_v12 = vpop.eup %1639 }
 0x3df   :  { %v1030_v15 = vsel %vm324_vm2, %v1640_v12, 0.0  ;;  %v1073_v16 = vpack.c.bf16 %v1640_v12, %v1640_v12  ;;  %v1642_v40 = vpop.eup %1641 }
 0x3e0   :  { %1031 = vadd.xlane.f32.xlu0 %v1030_v15  ;;  %v1644_v41 = vpop.eup %1643  ;;  %v1017_v17 = vmul.f32 %v1642_v40, %v1013_v47 }
 0x3e1   :  { %1602 = vmatmul.mubr.msk.bf16.vlgmr.msra.gmra.mrb[20].mxu1 %vm324_vm2, %v1073_v16  ;;  %v1646_v43 = vpop.eup %1645  ;;  %v1019_v55 = vmul.f32 %v1644_v41, %v1015_v20 }
 0x3e2   :  { %v1020_v27 = vmul.f32 %v1646_v43, %v1016_v24 }
 0x3e6   :  { %v1648_v45 = vpop.eup %1647 }
 0x3e7   :  { %v1018_v50 = vmul.f32 %v1648_v45, %v1014_v46 }
 0x3e9   :  { %1048 = vperm.xlu1 %1625, %v1642_v40  }
 0x3ed   :  { %1058 = vperm.xlu1 %1625, %v1644_v41  }
 0x3f1   :  { %1063 = vperm.xlu1 %1625, %v1646_v43  }
 0x3f6   :  { %1053 = vperm.xlu0 %1626, %v1648_v45  }
 0x45d   :  { %v1023_v18 = vpop.xlane.xlu0 %1022 }
 0x45e   :  { %v1033_v52 = vadd.f32 %v1023_v18, %v1017_v17 }
 0x460   :  { %1038 = vst.msk [vmem:[#allocation4] sm:$0xff] %vm315_vm4, %v1033_v52 }
 0x461   :  { %v1029_v58 = vpop.xlane.xlu0 %1028 }
 0x462   :  { %v1035_v49 = vadd.f32 %v1029_v58, %v1019_v55 }
 0x464   :  { %1040 = vst.msk [vmem:[#allocation4 + $0x10] sm:$0xff] %vm315_vm4, %v1035_v49 }
 0x465   :  { %v1026_v21 = vpop.xlane.xlu1 %1025 }
 0x466   :  { %v1034_v22 = vadd.f32 %v1026_v21, %v1018_v50 }
 0x467   :  { %v1278_v23 = vld [vmem:[#allocation4] sm:$0xff] }
 0x468   :  { %1039 = vst.msk [vmem:[#allocation4 + $0x8] sm:$0xff] %vm315_vm4, %v1034_v22  ;;  %1649 = vrcp.f32 %v1278_v23 }
 0x469   :  { %v1049_v44 = vpop.permute.xlu1 %1048 }
 0x46a   :  { %v1066_v48 = vmul.f32 %v1049_v44, %v1042_v39 }
 0x46b   :  { %v1280_v26 = vld [vmem:[#allocation4 + $0x10] sm:$0xff] }
 0x46c   :  { %1651 = vrcp.f32 %v1280_v26 }
 0x46d   :  { %v1032_v28 = vpop.xlane.xlu0 %1031  ;;  %v1059_v60 = vpop.permute.xlu1 %1058 }
 0x46e   :  { %v1036_v29 = vadd.f32 %v1032_v28, %v1020_v27  ;;  %v1068_v63 = vmul.f32 %v1059_v60, %v1044_v59 }
 0x46f   :  { %v1279_v30 = vld [vmem:[#allocation4 + $0x8] sm:$0xff] }
 0x470   :  { %1041 = vst.msk [vmem:[#allocation4 + $0x18] sm:$0xff] %vm315_vm4, %v1036_v29  ;;  %1653 = vrcp.f32 %v1279_v30 }
 0x471   :  { %v1064_v5 = vpop.permute.xlu1 %1063 }
 0x472   :  { %v1650_v32 = vpop.eup %1649  ;;  %v1069_v11 = vmul.f32 %v1064_v5, %v1045_v10 }
 0x473   :  { %1288 = vperm.xlu0 %1626, %v1650_v32  }
 0x475   :  { %v1054_v62 = vpop.permute.xlu0 %1053 }
 0x476   :  { %v1652_v33 = vpop.eup %1651  ;;  %v1067_v1 = vmul.f32 %v1054_v62, %v1043_v61 }
 0x477   :  { %1298 = vperm.xlu0 %1626, %v1652_v33   ;;  %v1281_v34 = vld [vmem:[#allocation4 + $0x18] sm:$0xff] }
 0x478   :  { %1655 = vrcp.f32 %v1281_v34 }
 0x47a   :  { %v1654_v36 = vpop.eup %1653 }
 0x47b   :  { %1293 = vperm.xlu1 %1625, %v1654_v36  }
 0x482   :  { %v1656_v37 = vpop.eup %1655 }
 0x483   :  { %1303 = vperm.xlu1 %1625, %v1656_v37  }
 0x4a4   :  { %v1115_v51 = vpop.f32.mrb[12].mxu0 }
 0x4a5   :  { %v1259_v53 = vadd.f32 %v1115_v51, %v1066_v48  ;;  %v1585_v54 = vpop.f32.mrb[13].mxu0 }
 0x4a6   :  { %v1118_v56 = vpop.f32.mrb[14].mxu0 }
 0x4a7   :  { %1263 = vst.msk [vmem:[#allocation5] sm:$0xff] %vm324_vm2, %v1259_v53  ;;  %v1586_v57 = vpop.f32.mrb[15].mxu0 }
 0x4ac   :  { %v1161_v2 = vpop.f32.mrb[16].mxu1  ;;  %v1207_v3 = vpop.f32.mrb[16].mxu0 }
 0x4ad   :  { %v1260_v4 = vadd.f32 %v1161_v2, %v1067_v1  ;;  %v1261_v6 = vadd.f32 %v1207_v3, %v1068_v63  ;;  %v1591_v7 = vpop.f32.mrb[17].mxu1  ;;  %v1597_v8 = vpop.f32.mrb[17].mxu0 }
 0x4ae   :  { %v1164_v14 = vpop.f32.mrb[18].mxu1  ;;  %v1210_v9 = vpop.f32.mrb[18].mxu0  ;;  %v1274_v45 = vld [vmem:[#allocation5] sm:$0xff] }
 0x4af   :  { %1264 = vst.msk [vmem:[#allocation5 + $0x8] sm:$0xff] %vm324_vm2, %v1260_v4  ;;  %1265 = vst.msk [vmem:[#allocation5 + $0x10] sm:$0xff] %vm324_vm2, %v1261_v6  ;;  %v1592_v19 = vpop.f32.mrb[19].mxu1  ;;  %v1598_v25 = vpop.f32.mrb[19].mxu0 }
 0x4b4   :  { %v1253_v31 = vpop.f32.mrb[20].mxu1 }
 0x4b5   :  { %v1262_v12 = vadd.f32 %v1253_v31, %v1069_v11  ;;  %v1603_v13 = vpop.f32.mrb[21].mxu1 }
 0x4b6   :  { %v1256_v15 = vpop.f32.mrb[22].mxu1  ;;  %v1276_v40 = vld [vmem:[#allocation5 + $0x10] sm:$0xff]  ;;  %v1275_v17 = vld [vmem:[#allocation5 + $0x8] sm:$0xff] }
 0x4b7   :  { %1266 = vst.msk [vmem:[#allocation5 + $0x18] sm:$0xff] %vm324_vm2, %v1262_v12  ;;  %v1604_v16 = vpop.f32.mrb[23].mxu1 }
 0x4be   :  { %v1277_v18 = vld [vmem:[#allocation5 + $0x18] sm:$0xff] }
 0x4f2   :  { %v1289_v38 = vpop.permute.xlu0 %1288 }
 0x4f3   :  { %v1306_v47 = vmul.f32 %v1289_v38, %v1274_v45 }
 0x4f6   :  { %v1299_v0 = vpop.permute.xlu0 %1298 }
 0x4f7   :  { %v1308_v43 = vmul.f32 %v1299_v0, %v1276_v40 }
 0x4f9   :  { %v1310_v52 = vcombine.low %v1306_v47, %v1308_v43  ;;  %v1311_v55 = vcombine.high %v1306_v47, %v1308_v43 }
 0x4fa   :  { %v1294_v41 = vpop.permute.xlu1 %1293 }
 0x4fb   :  { %v1307_v58 = vmul.f32 %v1294_v41, %v1275_v17  ;;  %v1318_v21 = vrot.slane %v1310_v52, %v1982_v35  ;;  %v1325_v22 = vrot.slane %v1311_v55, %v1982_v35 }
 0x502   :  { %v1304_v20 = vpop.permute.xlu1 %1303 }
 0x503   :  { %v1309_v46 = vmul.f32 %v1304_v20, %v1277_v18 }
 0x505   :  { %v1326_v49 = vcombine.low %v1307_v58, %v1309_v46  ;;  %v1327_v50 = vcombine.high %v1307_v58, %v1309_v46 }
 0x507   :  { %v1334_v23 = vrot.slane %v1326_v49, %v1982_v35  ;;  %v1341_v24 = vrot.slane %v1327_v50, %v1982_v35 }
 0x509   :  { %v1342_v26 = vcombine.low %v1318_v21, %v1334_v23  ;;  %v1343_v27 = vcombine.high %v1318_v21, %v1334_v23  ;;  %v1358_v28 = vcombine.low %v1325_v22, %v1341_v24  ;;  %v1359_v29 = vcombine.high %v1325_v22, %v1341_v24 }
 0x50b   :  { %v1350_v30 = vrot.slane %v1342_v26, %v1984_v42  ;;  %v1357_v32 = vrot.slane %v1343_v27, %v1984_v42  ;;  %v1366_v33 = vrot.slane %v1358_v28, %v1984_v42  ;;  %v1373_v34 = vrot.slane %v1359_v29, %v1984_v42 }
 0x50d   :  { %v1378_v36 = vcombine.low %v1350_v30, %v1357_v32  ;;  %v1506_v37 = vcombine.high %v1350_v30, %v1357_v32  ;;  %v1394_v39 = vcombine.low %v1366_v33, %v1373_v34  ;;  %v1507_v44 = vcombine.high %v1366_v33, %v1373_v34 }
 0x50f   :  { %v1385_v48 = vrot.slane %v1378_v36, %v1982_v35  ;;  %v1393_v51 = vrot.slane %v1506_v37, %v1982_v35  ;;  %v1401_v53 = vrot.slane %v1394_v39, %v1982_v35  ;;  %v1409_v54 = vrot.slane %v1507_v44, %v1982_v35 }
 0x511   :  { %v1411_v56 = vcombine.high %v1385_v48, %v1393_v51  ;;  %v1427_v57 = vcombine.high %v1401_v53, %v1409_v54  ;;  %v1410_v59 = vcombine.low %v1385_v48, %v1393_v51  ;;  %v1426_v60 = vcombine.low %v1401_v53, %v1409_v54 }
 0x513   :  { %v1425_v61 = vrot.slane %v1411_v56, %v1984_v42  ;;  %v1441_v62 = vrot.slane %v1427_v57, %v1984_v42  ;;  %v1418_v63 = vrot.slane %v1410_v59, %v1984_v42  ;;  %v1434_v1 = vrot.slane %v1426_v60, %v1984_v42 }
 0x515   :  { %v1444_v2 = vcombine.low %v1425_v61, %v1441_v62  ;;  %v1443_v3 = vcombine.high %v1418_v63, %v1434_v1  ;;  %v1442_v4 = vcombine.low %v1418_v63, %v1434_v1  ;;  %v1445_v35 = vcombine.high %v1425_v61, %v1441_v62 }
 0x517   :  { %1451 = vrot.lane.b32.xlu1 %v1444_v2, %s1813_s6  ;;  %1447 = vrot.lane.b32.xlu0 %v1443_v3, %s1814_s18 }
 0x51b   :  { %1455 = vrot.lane.b32.xlu0 %v1445_v35, %s1815_s19 }
 0x589   :  { %v1448_v6 = vpop.permute.xlu0 %1447  ;;  %v1452_v7 = vpop.permute.xlu1 %1451 }
 0x58a   :  { %v1458_v8 = vsel %vm324_vm2, %v1442_v4, %v1448_v6 }
 0x58b   :  { %v1460_v42 = vsel %vm1459_vm6, %v1458_v8, %v1452_v7 }
 0x58d   :  { %v1456_v14 = vpop.permute.xlu0 %1455 }
 0x58e   :  { %v1462_v9 = vsel %vm1461_vm7, %v1460_v42, %v1456_v14 }
 0x58f   :  { %v1463_v19 = vpack.c.bf16 %v1462_v9, %v1462_v9 }
 0x591   :  { %1465 = vst.msk [vmem:[#allocation15] sm:$0xf] %vm1464_vm8, %v1463_v19 }
 0x592   :  { %1778 = shalt.err (!%p1775_p2)
}
 0x593   :  { %s1779_s25 = scalar_lea.hbm %s2215_s7, 64 }
 0x594   :  { %p1780_p3 = scmp.ne.s32.totalorder %s2215_s7, %s1779_s25  ;;  %p1783_p4 = scmp.lt.u32.totalorder %s1779_s25, %s2215_s7 }
 0x596   :  { %p1785_p5 = pnand %p1783_p4, %p1780_p3 }
 0x598   :  { %1788 = shalt.err (!%p1785_p5)
}
 0x599   :  { %1475 = dma.vmem_to_hbm [thread:$0]  %s1473_s21, 64, %s2215_s7, [#allocation8]  }
 0x59a   :  { %1795 = dma.done.wait [#allocation8], 64  }
 0x59b   :  { %1796 = vsyncadd [#allocation8], 4294967232 }
 0x59c   :  { %1479 = vsyncpa [#allocation7], 1 }
 0x59d   :  { %1480 = vsyncpa [#allocation10], 1 }
 0x59e   :  { %1481 = vsyncpa [#allocation13], 1 }
 0x59f   :  { %1482 = vsyncpa [#allocation8], 1 }

</bundles_post_ra>
